<compile_context>
chip_gen: v7x
topology: tpu7x:2x2x1
jax: 0.10.0
libtpu: 0.0.40
codegen_flags: <defaults>
</compile_context>

<pallas_src>
import math

import jax
import jax.numpy as jnp
from jax.experimental import pallas as pl
from jax.experimental.pallas import tpu as pltpu


# ----------------------------------------------------------------------------
# Kernel
# ----------------------------------------------------------------------------
def _t_approximator_kernel(
    t_ref,      # (1, TB)        f32   time values (batch on lanes)
    w1_ref,     # (H, 12)        f32   (emb @ mw1)^T  fused month table
    b1_ref,     # (H, 1)         f32
    w2_ref,     # (H, H)         f32   mw2^T
    b2_ref,     # (H, 1)         f32
    tpw_ref,    # (Pd', 1)       f32   cos_scale-folded periodic weights (zero-padded)
    tpb_ref,    # (Pd', 1)       f32
    tnw_ref,    # (Nd', 1)       f32   aperiodic weights (zero-padded)
    tnb_ref,    # (Nd', 1)       f32
    wout_ref,   # (1, H+Pd'+Nd') f32   merged output projection (bias folded in)
    o_ref,      # (1, TB)        f32
):
    t = t_ref[...]                                          # (1, TB)
    tb = t.shape[1]

    # ---- month index -> one-hot (12, TB); matches torch `%` then .to(int64) ----
    m_idx = jnp.mod(t, 12.0).astype(jnp.int32)              # (1, TB)
    row_iota = jax.lax.broadcasted_iota(jnp.int32, (12, tb), 0)
    onehot = (row_iota == m_idx).astype(jnp.float32)        # (12, TB)

    # ---- m_encoder (CustomMLP): gather + layer1 fused into one matmul ----
    h1 = jnp.maximum(
        jnp.dot(w1_ref[...], onehot, preferred_element_type=jnp.float32)
        + b1_ref[...], 0.0)                                  # (H, TB)
    h2 = jnp.maximum(
        jnp.dot(w2_ref[...], h1, preferred_element_type=jnp.float32)
        + b2_ref[...], 0.0)                                  # (H, TB)

    # ---- t_encoder branches: K=1 outer products done on the VPU ----
    per = jnp.cos(tpw_ref[...] * t + tpb_ref[...])           # (Pd', TB)
    aper = jnp.maximum(tnw_ref[...] * t + tnb_ref[...], 0.0)  # (Nd', TB)

    # ---- merged output projection: xm + xt (+ bias via the cos(0)=1 pad unit) ----
    packed = jnp.concatenate([h2, per, aper], axis=0)         # (H+Pd'+Nd', TB)
    o_ref[...] = jnp.dot(wout_ref[...], packed,
                         preferred_element_type=jnp.float32)  # (1, TB)


# ----------------------------------------------------------------------------
# Wrapper
# ----------------------------------------------------------------------------
def t_approximator(t, kparams, tile_b=2048):
    """t: (B, 1) float32 -> (B, 1) float32."""
    B = t.shape[0]
    tile_b = max(128, (tile_b // 128) * 128)        # lane-aligned tile
    b128 = ((B + 127) // 128) * 128
    tb = min(tile_b, b128)                          # don't over-tile tiny batches
    B_pad = ((B + tb - 1) // tb) * tb               # pad ragged batch in wrapper

    t_row = jnp.pad(jnp.reshape(t.astype(jnp.float32), (B,)), (0, B_pad - B))
    t_row = jnp.reshape(t_row, (1, B_pad))

    weights = (kparams["w1"], kparams["b1"], kparams["w2"], kparams["b2"],
               kparams["tpw"], kparams["tpb"], kparams["tnw"], kparams["tnb"],
               kparams["wout"])
    w_specs = [pl.BlockSpec(w.shape, lambda i: (0, 0)) for w in weights]

    out = pl.pallas_call(
        _t_approximator_kernel,
        out_shape=jax.ShapeDtypeStruct((1, B_pad), jnp.float32),
        grid=(B_pad // tb,),
        in_specs=[pl.BlockSpec((1, tb), lambda i: (0, i))] + w_specs,
        out_specs=pl.BlockSpec((1, tb), lambda i: (0, i)),
        compiler_params=pltpu.CompilerParams(
            dimension_semantics=("parallel",)),      # use both v7x TensorCores
    )(t_row, *weights)

    return out[0, :B].reshape(B, 1)


# ----------------------------------------------------------------------------
# Parameter construction (module layout) and host-side packing for the kernel
# ----------------------------------------------------------------------------
def init_params(key, m_embed_dim, hid_dim, cos_len, periodic_ratio=0.2):
    """Parameters in the natural (PyTorch-like) layout."""
    pd = int(hid_dim * periodic_ratio)
    nd = hid_dim - pd
    ks = jax.random.split(key, 7)

    def lin(k, fi, fo):
        bound = 1.0 / math.sqrt(max(fi, 1))
        kw, kb = jax.random.split(k)
        w = jax.random.uniform(kw, (fi, fo), jnp.float32, -bound, bound)
        b = jax.random.uniform(kb, (fo,), jnp.float32, -bound, bound)
        return w, b

    emb = jax.random.normal(ks[0], (12, m_embed_dim), jnp.float32)
    mw1, mb1 = lin(ks[1], m_embed_dim, hid_dim)
    mw2, mb2 = lin(ks[2], hid_dim, hid_dim)
    mw3, mb3 = lin(ks[3], hid_dim, 1)
    tpw, tpb = lin(ks[4], 1, pd)
    tnw, tnb = lin(ks[5], 1, nd)
    tw2, tb2 = lin(ks[6], pd + nd, 1)

    return dict(emb=emb, mw1=mw1, mb1=mb1, mw2=mw2, mb2=mb2, mw3=mw3, mb3=mb3,
                tpw=tpw, tpb=tpb, tnw=tnw, tnb=tnb, tw2=tw2, tb2=tb2,
                cos_len=float(cos_len), pd=pd, nd=nd)


def pack_params(raw):
    """One-time host-side folding into the kernel layout (transposed, fused)."""
    H = raw["mw2"].shape[0]
    pd, nd = raw["pd"], raw["nd"]
    cs = 2.0 * math.pi / raw["cos_len"]

    w1 = jnp.transpose(raw["emb"] @ raw["mw1"]).astype(jnp.float32)   # (H, 12)
    b1 = raw["mb1"].reshape(H, 1)
    w2 = jnp.transpose(raw["mw2"]).astype(jnp.float32)                # (H, H)
    b2 = raw["mb2"].reshape(H, 1)

    # Pad branch widths to sublane multiples (zero weights keep semantics exact);
    # always reserve >=1 padded periodic unit to carry the combined output bias
    # (that unit evaluates cos(0*t + 0) == 1, output weight = bias).
    pdp = (pd // 8 + 1) * 8
    ndp = max(((nd + 7) // 8) * 8, 8)

    tpw = jnp.zeros((pdp, 1), jnp.float32).at[:pd, 0].set(cs * raw["tpw"][0])
    tpb = jnp.zeros((pdp, 1), jnp.float32).at[:pd, 0].set(cs * raw["tpb"])
    tnw = jnp.zeros((ndp, 1), jnp.float32).at[:nd, 0].set(raw["tnw"][0])
    tnb = jnp.zeros((ndp, 1), jnp.float32).at[:nd, 0].set(raw["tnb"])

    bias = raw["mb3"][0] + raw["tb2"][0]
    wout = jnp.zeros((1, H + pdp + ndp), jnp.float32)
    wout = wout.at[0, :H].set(raw["mw3"][:, 0])                 # xm projection
    wout = wout.at[0, H:H + pd].set(raw["tw2"][:pd, 0])         # periodic part
    wout = wout.at[0, H + pd].set(bias)                         # bias unit (cos(0)=1)
    wout = wout.at[0, H + pdp:H + pdp + nd].set(raw["tw2"][pd:, 0])  # aperiodic part

    return dict(w1=w1, b1=b1, w2=w2, b2=b2,
                tpw=tpw, tpb=tpb, tnw=tnw, tnb=tnb, wout=wout)


# ----------------------------------------------------------------------------
# Pure-JAX reference (mirrors the PyTorch module) for validation
# ----------------------------------------------------------------------------
def t_approximator_reference(t, raw):
    cs = 2.0 * math.pi / raw["cos_len"]
    m = jnp.mod(t, 12.0).astype(jnp.int32)[:, 0]                 # (B,)
    m_embed = jnp.take(raw["emb"], m, axis=0)                    # (B, E)
    h1 = jax.nn.relu(m_embed @ raw["mw1"] + raw["mb1"])
    h2 = jax.nn.relu(h1 @ raw["mw2"] + raw["mb2"])
    xm = h2 @ raw["mw3"] + raw["mb3"]                            # (B, 1)
    per = jnp.cos(cs * (t @ raw["tpw"] + raw["tpb"]))            # (B, Pd)
    aper = jax.nn.relu(t @ raw["tnw"] + raw["tnb"])              # (B, Nd)
    xt = jnp.concatenate([per, aper], axis=1) @ raw["tw2"] + raw["tb2"]
    return xt + xm


if __name__ == "__main__":
    key = jax.random.PRNGKey(0)
    k_param, k_t = jax.random.split(key)

    B, m_embed_dim, hid_dim, cos_len = 8, 8, 32, 12
    raw = init_params(k_param, m_embed_dim, hid_dim, cos_len, periodic_ratio=0.2)
    kparams = pack_params(raw)

    # t is a (B, 1) float "time" input (e.g. month-valued timestamps)
    t = jax.random.uniform(k_t, (B, 1), jnp.float32, 0.0, 60.0)

    out = t_approximator(t, kparams)
    jax.block_until_ready(out)
    assert out.shape == (B, 1) and out.dtype == jnp.float32

    ref = t_approximator_reference(t, raw)
    err = float(jnp.max(jnp.abs(out - ref)))
    scale = float(jnp.max(jnp.abs(ref))) + 1.0
    assert err <= 2e-2 * scale, (err, scale)

    print("KERNEL_OK")
</pallas_src>

<mosaic_0001>
module attributes {stable_mosaic.version = 11 : i64} {
  func.func @_t_approximator_kernel(%arg0: i32, %arg1: memref<1x128xf32, #tpu.memory_space<vmem>>, %arg2: memref<32x12xf32, #tpu.memory_space<vmem>>, %arg3: memref<32x1xf32, #tpu.memory_space<vmem>>, %arg4: memref<32x32xf32, #tpu.memory_space<vmem>>, %arg5: memref<32x1xf32, #tpu.memory_space<vmem>>, %arg6: memref<8x1xf32, #tpu.memory_space<vmem>>, %arg7: memref<8x1xf32, #tpu.memory_space<vmem>>, %arg8: memref<32x1xf32, #tpu.memory_space<vmem>>, %arg9: memref<32x1xf32, #tpu.memory_space<vmem>>, %arg10: memref<1x72xf32, #tpu.memory_space<vmem>>, %arg11: memref<1x128xf32, #tpu.memory_space<vmem>>) attributes {dimension_semantics = [#tpu.dimension_semantics<parallel>], iteration_bounds = array<i64: 1>, scalar_prefetch = 0 : i64, scratch_operands = 0 : i64, tpu.core_type = #tpu.core_type<tc>, window_params = [{transform_indices = @transform_0, window_bounds = array<i64: 1, 128>}, {pipeline_mode = #tpu.pipeline_mode<synchronous>, transform_indices = @transform_1, window_bounds = array<i64: 32, 12>}, {pipeline_mode = #tpu.pipeline_mode<synchronous>, transform_indices = @transform_2, window_bounds = array<i64: 32, 1>}, {pipeline_mode = #tpu.pipeline_mode<synchronous>, transform_indices = @transform_3, window_bounds = array<i64: 32, 32>}, {pipeline_mode = #tpu.pipeline_mode<synchronous>, transform_indices = @transform_4, window_bounds = array<i64: 32, 1>}, {pipeline_mode = #tpu.pipeline_mode<synchronous>, transform_indices = @transform_5, window_bounds = array<i64: 8, 1>}, {pipeline_mode = #tpu.pipeline_mode<synchronous>, transform_indices = @transform_6, window_bounds = array<i64: 8, 1>}, {pipeline_mode = #tpu.pipeline_mode<synchronous>, transform_indices = @transform_7, window_bounds = array<i64: 32, 1>}, {pipeline_mode = #tpu.pipeline_mode<synchronous>, transform_indices = @transform_8, window_bounds = array<i64: 32, 1>}, {pipeline_mode = #tpu.pipeline_mode<synchronous>, transform_indices = @transform_9, window_bounds = array<i64: 1, 72>}, {transform_indices = @transform_10, window_bounds = array<i64: 1, 128>}]} {
    %c0 = arith.constant 0 : index
    %c0_0 = arith.constant 0 : index
    %0 = vector.load %arg1[%c0, %c0_0] : memref<1x128xf32, #tpu.memory_space<vmem>>, vector<1x128xf32>
    %cst = arith.constant 1.200000e+01 : f32
    %1 = vector.broadcast %cst : f32 to vector<1x128xf32>
    %2 = arith.remf %0, %1 : vector<1x128xf32>
    %cst_1 = arith.constant 0.000000e+00 : f32
    %3 = vector.broadcast %cst_1 : f32 to vector<1x128xf32>
    %4 = arith.cmpf one, %2, %3 : vector<1x128xf32>
    %cst_2 = arith.constant 0.000000e+00 : f32
    %5 = vector.broadcast %cst_2 : f32 to vector<1x128xf32>
    %6 = arith.cmpf olt, %2, %5 : vector<1x128xf32>
    %cst_3 = arith.constant 0.000000e+00 : f32
    %7 = arith.cmpf olt, %cst, %cst_3 : f32
    %8 = vector.broadcast %7 : i1 to vector<1x128xi1>
    %9 = vector.broadcast %8 : vector<1x128xi1> to vector<1x128xi1>
    %10 = arith.xori %6, %9 : vector<1x128xi1>
    %11 = arith.andi %10, %4 : vector<1x128xi1>
    %12 = vector.broadcast %cst : f32 to vector<1x128xf32>
    %13 = arith.addf %2, %12 : vector<1x128xf32>
    %14 = arith.select %11, %13, %2 : vector<1x128xi1>, vector<1x128xf32>
    %15 = arith.fptosi %14 : vector<1x128xf32> to vector<1x128xi32>
    %16 = tpu.iota {dimensions = array<i32: 0>} : vector<12x128xi32>
    %17 = vector.broadcast %15 : vector<1x128xi32> to vector<12x128xi32>
    %18 = arith.cmpi eq, %16, %17 : vector<12x128xi32>
    %19 = arith.extui %18 : vector<12x128xi1> to vector<12x128xi32>
    %20 = arith.sitofp %19 : vector<12x128xi32> to vector<12x128xf32>
    %c0_4 = arith.constant 0 : index
    %c0_5 = arith.constant 0 : index
    %21 = vector.load %arg2[%c0_4, %c0_5] : memref<32x12xf32, #tpu.memory_space<vmem>>, vector<32x12xf32>
    %cst_6 = arith.constant dense<0.000000e+00> : vector<32x128xf32>
    %22 = tpu.matmul %21, %20, %cst_6 {dimension_numbers = #tpu.dot_dimension_numbers<[1], [0], [0], [1], [0, 0, 1, 1], [], []>} : vector<32x12xf32>, vector<12x128xf32>, vector<32x128xf32> -> vector<32x128xf32>
    %c0_7 = arith.constant 0 : index
    %c0_8 = arith.constant 0 : index
    %23 = vector.load %arg3[%c0_7, %c0_8] : memref<32x1xf32, #tpu.memory_space<vmem>>, vector<32x1xf32>
    %24 = vector.broadcast %23 : vector<32x1xf32> to vector<32x128xf32>
    %25 = arith.addf %22, %24 : vector<32x128xf32>
    %cst_9 = arith.constant 0.000000e+00 : f32
    %26 = vector.broadcast %cst_9 : f32 to vector<32x128xf32>
    %27 = arith.maximumf %25, %26 : vector<32x128xf32>
    %c0_10 = arith.constant 0 : index
    %c0_11 = arith.constant 0 : index
    %28 = vector.load %arg4[%c0_10, %c0_11] : memref<32x32xf32, #tpu.memory_space<vmem>>, vector<32x32xf32>
    %cst_12 = arith.constant dense<0.000000e+00> : vector<32x128xf32>
    %29 = tpu.matmul %28, %27, %cst_12 {dimension_numbers = #tpu.dot_dimension_numbers<[1], [0], [0], [1], [0, 0, 1, 1], [], []>} : vector<32x32xf32>, vector<32x128xf32>, vector<32x128xf32> -> vector<32x128xf32>
    %c0_13 = arith.constant 0 : index
    %c0_14 = arith.constant 0 : index
    %30 = vector.load %arg5[%c0_13, %c0_14] : memref<32x1xf32, #tpu.memory_space<vmem>>, vector<32x1xf32>
    %31 = vector.broadcast %30 : vector<32x1xf32> to vector<32x128xf32>
    %32 = arith.addf %29, %31 : vector<32x128xf32>
    %cst_15 = arith.constant 0.000000e+00 : f32
    %33 = vector.broadcast %cst_15 : f32 to vector<32x128xf32>
    %34 = arith.maximumf %32, %33 : vector<32x128xf32>
    %c0_16 = arith.constant 0 : index
    %c0_17 = arith.constant 0 : index
    %35 = vector.load %arg6[%c0_16, %c0_17] : memref<8x1xf32, #tpu.memory_space<vmem>>, vector<8x1xf32>
    %36 = vector.broadcast %35 : vector<8x1xf32> to vector<8x128xf32>
    %37 = vector.broadcast %0 : vector<1x128xf32> to vector<8x128xf32>
    %38 = arith.mulf %36, %37 : vector<8x128xf32>
    %c0_18 = arith.constant 0 : index
    %c0_19 = arith.constant 0 : index
    %39 = vector.load %arg7[%c0_18, %c0_19] : memref<8x1xf32, #tpu.memory_space<vmem>>, vector<8x1xf32>
    %40 = vector.broadcast %39 : vector<8x1xf32> to vector<8x128xf32>
    %41 = arith.addf %38, %40 : vector<8x128xf32>
    %42 = math.cos %41 : vector<8x128xf32>
    %c0_20 = arith.constant 0 : index
    %c0_21 = arith.constant 0 : index
    %43 = vector.load %arg8[%c0_20, %c0_21] : memref<32x1xf32, #tpu.memory_space<vmem>>, vector<32x1xf32>
    %44 = vector.broadcast %43 : vector<32x1xf32> to vector<32x128xf32>
    %45 = vector.broadcast %0 : vector<1x128xf32> to vector<32x128xf32>
    %46 = arith.mulf %44, %45 : vector<32x128xf32>
    %c0_22 = arith.constant 0 : index
    %c0_23 = arith.constant 0 : index
    %47 = vector.load %arg9[%c0_22, %c0_23] : memref<32x1xf32, #tpu.memory_space<vmem>>, vector<32x1xf32>
    %48 = vector.broadcast %47 : vector<32x1xf32> to vector<32x128xf32>
    %49 = arith.addf %46, %48 : vector<32x128xf32>
    %cst_24 = arith.constant 0.000000e+00 : f32
    %50 = vector.broadcast %cst_24 : f32 to vector<32x128xf32>
    %51 = arith.maximumf %49, %50 : vector<32x128xf32>
    %52 = tpu.concatenate %34, %42, %51 in 0 : vector<32x128xf32>, vector<8x128xf32>, vector<32x128xf32> -> vector<72x128xf32>
    %c0_25 = arith.constant 0 : index
    %c0_26 = arith.constant 0 : index
    %53 = vector.load %arg10[%c0_25, %c0_26] : memref<1x72xf32, #tpu.memory_space<vmem>>, vector<1x72xf32>
    %cst_27 = arith.constant dense<0.000000e+00> : vector<1x128xf32>
    %54 = tpu.matmul %53, %52, %cst_27 {dimension_numbers = #tpu.dot_dimension_numbers<[1], [0], [0], [1], [0, 0, 1, 1], [], []>} : vector<1x72xf32>, vector<72x128xf32>, vector<1x128xf32> -> vector<1x128xf32>
    %c0_28 = arith.constant 0 : index
    %c0_29 = arith.constant 0 : index
    %55 = vector.load %arg11[%c0_28, %c0_29] : memref<1x128xf32, #tpu.memory_space<vmem>>, vector<1x128xf32>
    tpu.vector_store %arg11[%c0_28, %c0_29], %54 {strides = array<i32>} : memref<1x128xf32, #tpu.memory_space<vmem>>, vector<1x128xf32>,
    return
  }
  func.func @transform_0(%arg0: i32) -> (i32, i32) {
    %c0_i32 = arith.constant 0 : i32
    %c0_i32_0 = arith.constant 0 : i32
    return %c0_i32, %arg0 : i32, i32
  }
  func.func @transform_1(%arg0: i32) -> (i32, i32) {
    %c0_i32 = arith.constant 0 : i32
    %c0_i32_0 = arith.constant 0 : i32
    %c0_i32_1 = arith.constant 0 : i32
    return %c0_i32, %c0_i32_0 : i32, i32
  }
  func.func @transform_2(%arg0: i32) -> (i32, i32) {
    %c0_i32 = arith.constant 0 : i32
    %c0_i32_0 = arith.constant 0 : i32
    %c0_i32_1 = arith.constant 0 : i32
    return %c0_i32, %c0_i32_0 : i32, i32
  }
  func.func @transform_3(%arg0: i32) -> (i32, i32) {
    %c0_i32 = arith.constant 0 : i32
    %c0_i32_0 = arith.constant 0 : i32
    %c0_i32_1 = arith.constant 0 : i32
    return %c0_i32, %c0_i32_0 : i32, i32
  }
  func.func @transform_4(%arg0: i32) -> (i32, i32) {
    %c0_i32 = arith.constant 0 : i32
    %c0_i32_0 = arith.constant 0 : i32
    %c0_i32_1 = arith.constant 0 : i32
    return %c0_i32, %c0_i32_0 : i32, i32
  }
  func.func @transform_5(%arg0: i32) -> (i32, i32) {
    %c0_i32 = arith.constant 0 : i32
    %c0_i32_0 = arith.constant 0 : i32
    %c0_i32_1 = arith.constant 0 : i32
    return %c0_i32, %c0_i32_0 : i32, i32
  }
  func.func @transform_6(%arg0: i32) -> (i32, i32) {
    %c0_i32 = arith.constant 0 : i32
    %c0_i32_0 = arith.constant 0 : i32
    %c0_i32_1 = arith.constant 0 : i32
    return %c0_i32, %c0_i32_0 : i32, i32
  }
  func.func @transform_7(%arg0: i32) -> (i32, i32) {
    %c0_i32 = arith.constant 0 : i32
    %c0_i32_0 = arith.constant 0 : i32
    %c0_i32_1 = arith.constant 0 : i32
    return %c0_i32, %c0_i32_0 : i32, i32
  }
  func.func @transform_8(%arg0: i32) -> (i32, i32) {
    %c0_i32 = arith.constant 0 : i32
    %c0_i32_0 = arith.constant 0 : i32
    %c0_i32_1 = arith.constant 0 : i32
    return %c0_i32, %c0_i32_0 : i32, i32
  }
  func.func @transform_9(%arg0: i32) -> (i32, i32) {
    %c0_i32 = arith.constant 0 : i32
    %c0_i32_0 = arith.constant 0 : i32
    %c0_i32_1 = arith.constant 0 : i32
    return %c0_i32, %c0_i32_0 : i32, i32
  }
  func.func @transform_10(%arg0: i32) -> (i32, i32) {
    %c0_i32 = arith.constant 0 : i32
    %c0_i32_0 = arith.constant 0 : i32
    return %c0_i32, %arg0 : i32, i32
  }
}

</mosaic_0001>

<bundles_post_ra>
// kernel: tpu_custom_call.1
= control target key start
LH: loop header
LB: loop body
LE: loop exit
PB: predicated region body
PF: predicated region fallthrough
CT: control target
= control target key end

     0   :  { %v54_v2 = vlaneseq  ;;  %v764_v3 = vmov 0   ;;  %vm95_vm0 = vcmask 97280   ;;  %s984_s0 = inlined_call_operand.vmem [shape: f32[1,128], index: 0, kind: input, shape index: {}]   ;;  %s985_s1 = inlined_call_operand.vmem [shape: f32[32,12], index: 1, kind: input, shape index: {}]   ;;  %s986_s2 = inlined_call_operand.vmem [shape: f32[32,1], index: 2, kind: input, shape index: {}]   ;;  %s987_s3 = inlined_call_operand.vmem [shape: f32[32,32], index: 3, kind: input, shape index: {}]   ;;  %s988_s4 = inlined_call_operand.vmem [shape: f32[32,1], index: 4, kind: input, shape index: {}]   ;;  %s989_s5 = inlined_call_operand.vmem [shape: f32[8,1], index: 5, kind: input, shape index: {}]   ;;  %s990_s6 = inlined_call_operand.vmem [shape: f32[8,1], index: 6, kind: input, shape index: {}]   ;;  %s991_s7 = inlined_call_operand.vmem [shape: f32[32,1], index: 7, kind: input, shape index: {}]   ;;  %s992_s8 = inlined_call_operand.vmem [shape: f32[32,1], index: 8, kind: input, shape index: {}]   ;;  %s993_s9 = inlined_call_operand.vmem [shape: f32[1,72], index: 9, kind: input, shape index: {}]   ;;  %s994_s10 = inlined_call_operand.hbm [shape: f32[1,128], index: 10, kind: output, shape index: {}]  }
   0x1   :  { %v71_v0 = vld [vmem:[%s986_s2] sm:$0xff]  ;;  %734 = vset.pattern.permute.xlu0 %v764_v3  ;;  %735 = vset.pattern.permute.xlu1 %v764_v3  ;;  %v73_v5 = vld [vmem:[%s986_s2 + $0x10] sm:$0xff]  ;;  %v72_v9 = vld [vmem:[%s986_s2 + $0x8] sm:$0xff] }
   0x2   :  { %v36_v1 = vld [vmem:[%s984_s0] sm:$0x1]  ;;  %77 = vperm.xlu0 %734, %v71_v0   ;;  %v55_v6 = vshrl.u32 %v54_v2, 7  ;;  %87 = vperm.xlu1 %735, %v73_v5   ;;  %v74_v10 = vld [vmem:[%s986_s2 + $0x18] sm:$0xff] }
   0x3   :  { %v37_v4 = vand.u32 2147483647, %v36_v1  ;;  %v67_v7 = vld [vmem:[%s985_s1] sm:$0xff] }
   0x4   :  { %649 = vmatprep.mubr.msk.f32.mxu1 %vm95_vm0, %v67_v7  ;;  %v59_v11 = vsub.s32 0, %v55_v6  ;;  %v331_v15 = vld [vmem:[%s989_s5] sm:$0xff] }
   0x5   :  { %v39_v8 = vmul.f32 0.083333336, %v37_v4  ;;  %v344_v16 = vld [vmem:[%s990_s6] sm:$0xff] }
   0x6   :  { %v850_v13 = vrot.slane %v36_v1, %v59_v11  ;;  %82 = vperm.xlu0 %734, %v72_v9   ;;  %92 = vperm.xlu1 %735, %v74_v10  }
   0x7   :  { %v40_v12 = vfloor.f32 %v39_v8 }
   0x9   :  { %v41_v14 = vmul.f32 12.0, %v40_v12 }
   0xa   :  { %15 = vsyncpa [#allocation3], 0  ;;  %334 = vperm.xlu0 %734, %v331_v15   ;;  %347 = vperm.xlu1 %735, %v344_v16   ;;  %v46_v18 = vand.u32 2147483648, %v36_v1  ;;  %v205_v19 = vld [vmem:[%s988_s4] sm:$0xff]  ;;  %v206_v20 = vld [vmem:[%s988_s4 + $0x8] sm:$0xff]  ;;  %v56_v32 = vadd.s32 8, %v55_v6 }
   0xb   :  { %v42_v17 = vsub.f32 %v37_v4, %v41_v14  ;;  %v207_v24 = vld [vmem:[%s988_s4 + $0x10] sm:$0xff]  ;;  %v208_v25 = vld [vmem:[%s988_s4 + $0x18] sm:$0xff]  ;;  %v454_v28 = vld [vmem:[%s991_s7] sm:$0xff]  ;;  %vm108_vm5 = vcmask 1043456   ;;  %v765_v36 = vmov 0.0   ;;  %v766_v39 = vmov 1.0  }
   0xc   :  { %v482_v29 = vld [vmem:[%s992_s8] sm:$0xff]  ;;  %v455_v33 = vld [vmem:[%s991_s7 + $0x8] sm:$0xff]  ;;  %v456_v34 = vld [vmem:[%s991_s7 + $0x10] sm:$0xff]  ;;  %vm229_vm9 = vcmask 261120   ;;  %v767_v3 = vmov 683565275  }
   0xd   :  { %vm43_vm1 = vcmp.eq.f32.partialorder %v42_v17, 12.0  ;;  %v483_v38 = vld [vmem:[%s992_s8 + $0x8] sm:$0xff]  ;;  %v484_v41 = vld [vmem:[%s992_s8 + $0x10] sm:$0xff]  ;;  %v457_v43 = vld [vmem:[%s991_s7 + $0x18] sm:$0xff]  ;;  %v768_v5 = vmov 2475754826  }
   0xe   :  { %v44_v21 = vsel %vm43_vm1, 0.0, %v42_v17  ;;  %211 = vperm.xlu0 %734, %v205_v19   ;;  %216 = vperm.xlu1 %735, %v206_v20   ;;  %v68_v42 = vld [vmem:[%s985_s1 + $0x8] sm:$0xff]  ;;  %v69_v44 = vld [vmem:[%s985_s1 + $0x10] sm:$0xff]  ;;  %v485_v45 = vld [vmem:[%s992_s8 + $0x18] sm:$0xff]  ;;  %v769_v7 = vmov 2131351028  }
   0xf   :  { %v45_v22 = vand.u32 2147483647, %v44_v21  ;;  %v70_v46 = vld [vmem:[%s985_s1 + $0x18] sm:$0xff]  ;;  %v201_v49 = vld [vmem:[%s987_s3] sm:$0xff]  ;;  %v770_v9 = vmov 2102212464  }
  0x10   :  { %v772_v19 = vmov 1326507024   ;;  %s775_s16 = smov [#allocation2]  }
  0x11   :  { %v47_v23 = vor.u32 %v46_v18, %v45_v22  ;;  %s596_s4 = sshll.u32 %s775_s16, 4  ;;  %s597_s4 = int_to_ptr.vmem [resolvable:$true] %s596_s4 }
  0x12   :  { %221 = vperm.xlu0 %734, %v207_v24   ;;  %226 = vperm.xlu1 %735, %v208_v25   ;;  %s740_s17 = scalar_lea.vmem %s597_s4, 16  ;;  %s744_s18 = scalar_lea.vmem %s597_s4, 32 }
  0x13   :  { %vm48_vm2 = vcmp.ne.f32.partialorder %v47_v23, 0.0  ;;  %vm49_vm3 = vcmp.lt.f32.partialorder %v47_v23, 0.0  ;;  %v51_v26 = vadd.f32 12.0, %v47_v23  ;;  %p741_p0 = scmp.ne.s32.totalorder %s597_s4, %s740_s17  ;;  %p745_p1 = scmp.lt.s32.totalorder %s597_s4, %s597_s4 }
  0x14   :  { %vm50_vm4 = vmand %vm49_vm3, %vm48_vm2  ;;  %p746_p2 = scmp.lt.s32.totalorder %s744_s18, %s740_s17 }
  0x15   :  { %v52_v27 = vsel %vm50_vm4, %v51_v26, %v47_v23 }
  0x16   :  { %v716_v30 = vtrunc.f32 %v52_v27  ;;  %460 = vperm.xlu0 %734, %v454_v28   ;;  %488 = vperm.xlu1 %735, %v482_v29   ;;  %p747_p3 = por %p746_p2, %p745_p1 }
  0x18   :  { %v717_v31 = vcvt.f32.s32 %v716_v30  ;;  %p748_p4 = pnand %p747_p3, %p741_p0 }
  0x1a   :  { %v60_v35 = vrot.slane %v717_v31, %v59_v11  ;;  %465 = vperm.xlu0 %734, %v455_v33   ;;  %470 = vperm.xlu1 %735, %v456_v34   ;;  %v771_v11 = vmov 920167782  }
  0x1c   :  { %vm61_vm6 = vcmp.eq.s32.totalorder %v55_v6, %v60_v35  ;;  %vm62_vm7 = vcmp.eq.s32.totalorder %v56_v32, %v60_v35 }
  0x1d   :  { %v605_v37 = vsel %vm62_vm7, 1.0, %v765_v36  ;;  %vm691_vm8 = vmpackc.low %vm108_vm5, %vm61_vm6  ;;  %vm774_vm7 = vmmov 0  }
  0x1e   :  { %v690_v40 = vpack.c.bf16 %v605_v37, %v766_v39  ;;  %493 = vperm.xlu0 %734, %v483_v38   ;;  %498 = vperm.xlu1 %735, %v484_v41  }
  0x1f   :  { %687 = vmatprep.mubr.msk.f32.mxu0 %vm774_vm7, %v765_v36 }
  0x20   :  { %692 = vmatprep.subr.msk.bf16.mxu1 %vm691_vm8, %v690_v40 }
  0x21   :  { %695 = vmatpush3.bf16.msk.msra.mxu1 %vm691_vm8, %v690_v40  ;;  %vm515_vm8 = vcmask 588800  }
  0x22   :  { %475 = vperm.xlu0 %734, %v457_v43   ;;  %503 = vperm.xlu1 %735, %v485_v45  }
  0x24   :  { %650 = vmatmul.mubr.msk.f32.vlgmr.msra.gmra.mrb[0].mxu1 %vm95_vm0, %v68_v42 }
  0x25   :  { %652 = vmatprep.mubr.msk.f32.mxu1 %vm95_vm0, %v69_v44 }
  0x28   :  { %653 = vmatmul.mubr.msk.f32.gmra.mrb[2].mxu1 %vm95_vm0, %v70_v46 }
  0x29   :  { %663 = vmatprep.mubr.msk.f32.mxu1 %vm229_vm9, %v201_v49 }
  0x81   :  { %v907_v47 = vpop.permute.xlu0 %77  ;;  %v909_v48 = vpop.permute.xlu1 %87 }
  0x85   :  { %v915_v50 = vpop.permute.xlu0 %82  ;;  %v917_v51 = vpop.permute.xlu1 %92 }
  0x89   :  { %v335_v52 = vpop.permute.xlu0 %334  ;;  %v348_v53 = vpop.permute.xlu1 %347 }
  0x8a   :  { %v343_v54 = vmul.f32 %v850_v13, %v335_v52 }
  0x8c   :  { %v920_v55 = vadd.f32 %v348_v53, %v343_v54 }
  0x8e   :  { %v354_v56 = vand.u32 2139095040, %v920_v55  ;;  %v351_v58 = vand.u32 2147483647, %v920_v55  ;;  %vm353_vm1 = vcmp.lt.s32.totalorder %v920_v55, 0  ;;  %vm443_vm6 = vweird.f32 %v920_v55 }
  0x90   :  { %v355_v57 = vshrl.u32 %v354_v56, 23  ;;  %v358_v61 = vand.u32 8388607, %v351_v58  ;;  %vm352_vm2 = vcmp.le.f32.partialorder %v351_v58, 0.7853982 }
  0x92   :  { %v616_v59 = vadd.s32 4294967169, %v355_v57  ;;  %v359_v0 = vor.u32 8388608, %v358_v61 }
  0x94   :  { %v361_v60 = vadd.s32 1, %v616_v59  ;;  %v399_v21 = vshll.u32 %v359_v0, 8 }
  0x96   :  { %vm362_vm10 = vcmp.gt.s32.totalorder %v361_v60, 0 }
  0x97   :  { %v363_v62 = vsel %vm362_vm10, %v361_v60, 0 }
  0x98   :  { %v365_v63 = vand.u32 31, %v363_v62  ;;  %v364_v1 = vshrl.u32 %v363_v62, 5 }
  0x9a   :  { %v366_v2 = vsub.s32 32, %v365_v63  ;;  %v368_v4 = vshll.u32 %v767_v3, %v365_v63  ;;  %v371_v6 = vshll.u32 %v768_v5, %v365_v63  ;;  %v374_v8 = vshll.u32 %v769_v7, %v365_v63 }
  0x9b   :  { %v377_v10 = vshll.u32 %v770_v9, %v365_v63  ;;  %v380_v12 = vshll.u32 %v771_v11, %v365_v63  ;;  %vm383_vm11 = vcmp.lt.s32.totalorder %v364_v1, 1  ;;  %vm386_vm12 = vcmp.lt.s32.totalorder %v364_v1, 4 }
  0x9c   :  { %v367_v14 = vshrl.u32 %v767_v3, %v366_v2  ;;  %v369_v15 = vshrl.u32 %v768_v5, %v366_v2  ;;  %v372_v16 = vshrl.u32 %v769_v7, %v366_v2  ;;  %v375_v17 = vshrl.u32 %v770_v9, %v366_v2 }
  0x9d   :  { %v378_v18 = vshrl.u32 %v771_v11, %v366_v2  ;;  %v381_v20 = vshrl.u32 %v772_v19, %v366_v2  ;;  %vm384_vm13 = vcmp.lt.s32.totalorder %v364_v1, 2  ;;  %vm385_vm14 = vcmp.lt.s32.totalorder %v364_v1, 3 }
  0x9e   :  { %v370_v22 = vor.u32 %v369_v15, %v368_v4  ;;  %v373_v23 = vor.u32 %v372_v16, %v371_v6  ;;  %v376_v24 = vor.u32 %v375_v17, %v374_v8 }
  0x9f   :  { %v379_v25 = vor.u32 %v378_v18, %v377_v10  ;;  %v382_v26 = vor.u32 %v381_v20, %v380_v12  ;;  %v936_v10 = vpop.permute.xlu0 %211 }
  0xa0   :  { %v387_v27 = vsel %vm383_vm11, %v367_v14, %v370_v22  ;;  %v388_v28 = vsel %vm386_vm12, %v376_v24, 2102212464  ;;  %v391_v29 = vsel %vm383_vm11, %v370_v22, %v373_v23  ;;  %v395_v30 = vsel %vm383_vm11, %v373_v23, %v376_v24  ;;  %v217_v14 = vpop.permute.xlu1 %216 }
  0xa1   :  { %v389_v31 = vsel %vm385_vm14, %v373_v23, %v388_v28  ;;  %v392_v32 = vsel %vm386_vm12, %v379_v25, 920167782  ;;  %v396_v33 = vsel %vm386_vm12, %v382_v26, 1326507024 }
  0xa2   :  { %v393_v34 = vsel %vm385_vm14, %v376_v24, %v392_v32  ;;  %v397_v35 = vsel %vm385_vm14, %v379_v25, %v396_v33  ;;  %v390_v37 = vsel %vm384_vm13, %v387_v27, %v389_v31 }
  0xa3   :  { %v394_v38 = vsel %vm384_vm13, %v391_v29, %v393_v34  ;;  %v398_v39 = vsel %vm384_vm13, %v395_v30, %v397_v35  ;;  %v406_v44 = vmul.u32 %v399_v21, %v390_v37  ;;  %v941_v17 = vpop.permute.xlu0 %221 }
  0xa4   :  { %v926_v40 = vmul.u32.u64.low %v399_v21, %v398_v39  ;;  %v927_v41 = vmul.u32.u64.high %v399_v21, %v398_v39, %v926_v40  ;;  %v929_v42 = vmul.u32.u64.low %v399_v21, %v394_v38  ;;  %v930_v43 = vmul.u32.u64.high %v399_v21, %v394_v38, %v929_v42  ;;  %v227_v20 = vpop.permute.xlu1 %226 }
  0xa6   :  { %vm408_vm15 = vc.u32 %v927_v41, %v929_v42  ;;  %v409_v45 = vadd.s32 1, %v930_v43  ;;  %v407_v62 = vadd.s32 %v929_v42, %v927_v41 }
  0xa7   :  { %v461_v22 = vpop.permute.xlu0 %460 }
  0xa8   :  { %v410_v46 = vsel %vm408_vm15, %v409_v45, %v930_v43  ;;  %v478_v23 = vmul.f32 %v461_v22, %v850_v13  ;;  %v489_v25 = vpop.permute.xlu1 %488 }
  0xa9   :  { %v411_v49 = vadd.s32 %v410_v46, %v406_v44 }
  0xaa   :  { %v506_v26 = vadd.f32 %v489_v25, %v478_v23  ;;  %v514_v23 = vld [vmem:[%s993_s9] sm:$0x1] }
  0xab   :  { %v412_v52 = vadd.s32 536870912, %v411_v49 }
  0xac   :  { %v510_v31 = vmax.f32 %v506_v26, 0.0 }
  0xad   :  { %v413_v53 = vshrl.u32 %v412_v52, 30 }
  0xaf   :  { %v414_v54 = vshll.u32 %v413_v53, 30  ;;  %v437_v15 = vsub.s32 4, %v413_v53 }
  0xb1   :  { %v415_v56 = vsub.s32 %v411_v49, %v414_v54  ;;  %v438_v19 = vsel %vm353_vm1, %v437_v15, %v413_v53  ;;  %v466_v54 = vpop.permute.xlu0 %465 }
  0xb2   :  { %v440_v21 = vsel %vm352_vm2, 0, %v438_v19 }
  0xb3   :  { %v417_v57 = vsub.s32 0, %v415_v56  ;;  %v444_v24 = vand.u32 3, %v440_v21 }
  0xb5   :  { %v617_v59 = vmin.u32 %v417_v57, %v415_v56  ;;  %vm449_vm3 = vcmp.eq.s32.totalorder %v444_v24, 2  ;;  %vm446_vm4 = vcmp.eq.s32.totalorder %v444_v24, 0  ;;  %vm445_vm5 = vcmp.lt.s32.totalorder %v444_v24, 2 }
  0xb7   :  { %v419_v60 = vclz %v617_v59 }
  0xb9   :  { %v618_v61 = vadd.s32 4294967294, %v419_v60 }
  0xbb   :  { %vm619_vm0 = vcmp.lt.s32.totalorder %v618_v61, 0 }
  0xbc   :  { %v422_v63 = vsel %vm619_vm0, 0, %v618_v61  ;;  %v471_v61 = vpop.permute.xlu1 %470 }
  0xbd   :  { %v423_v0 = vsub.s32 32, %v422_v63  ;;  %v424_v1 = vshll.u32 %v415_v56, %v422_v63  ;;  %v427_v2 = vsub.s32 4294967266, %v422_v63 }
  0xbf   :  { %v425_v3 = vshrl.u32 %v407_v62, %v423_v0  ;;  %v428_v4 = vadd.s32 127, %v427_v2 }
  0xc1   :  { %v426_v5 = vor.u32 %v425_v3, %v424_v1  ;;  %v429_v6 = vshll.u32 %v428_v4, 23  ;;  %v494_v1 = vpop.permute.xlu0 %493  ;;  %v479_v4 = vmul.f32 %v466_v54, %v850_v13 }
  0xc3   :  { %v430_v7 = vor.u32 4788187, %v429_v6  ;;  %v433_v8 = vcvt.s32.f32 %v426_v5  ;;  %v480_v5 = vmul.f32 %v471_v61, %v850_v13 }
  0xc5   :  { %v431_v9 = vand.u32 2147483647, %v430_v7  ;;  %v476_v15 = vpop.permute.xlu0 %475 }
  0xc6   :  { %v481_v19 = vmul.f32 %v476_v15, %v850_v13 }
  0xc7   :  { %v434_v11 = vmul.f32 %v433_v8, %v431_v9 }
  0xc9   :  { %v435_v12 = vxor.u32 2147483648, %v434_v11 }
  0xcb   :  { %v436_v16 = vsel %vm353_vm1, %v435_v12, %v434_v11  ;;  %v499_v11 = vpop.permute.xlu1 %498 }
  0xcc   :  { %v439_v18 = vsel %vm352_vm2, %v920_v55, %v436_v16  ;;  %v508_v12 = vadd.f32 %v499_v11, %v480_v5 }
  0xcd   :  { %736 = vcosq.f32 %v439_v18 }
  0xce   :  { %738 = vsinq.f32 %v439_v18  ;;  %v512_v18 = vmax.f32 %v508_v12, 0.0 }
  0xd7   :  { %v737_v58 = vpop.eup %736 }
  0xd8   :  { %v739_v27 = vpop.eup %738  ;;  %v450_v28 = vxor.u32 2147483648, %v737_v58 }
  0xd9   :  { %v447_v29 = vxor.u32 2147483648, %v739_v27 }
  0xda   :  { %v451_v30 = vsel %vm449_vm3, %v450_v28, %v739_v27 }
  0xdb   :  { %v448_v32 = vsel %vm446_vm4, %v737_v58, %v447_v29 }
  0xdc   :  { %v452_v33 = vsel %vm445_vm5, %v448_v32, %v451_v30 }
  0xdd   :  { %v453_v34 = vsel %vm443_vm6, nan, %v452_v33 }
  0xde   :  { %v711_v35 = vpack.c.bf16 %v510_v31, %v453_v34 }
  0xf7   :  { %v651_v37 = vpop.f32.mrb[0].mxu1 }
  0xf8   :  { %v184_v38 = vadd.f32 %v651_v37, %v915_v50  ;;  %v178_v39 = vpop.f32.mrb[1].mxu1  ;;  %v203_v50 = vld [vmem:[%s987_s3 + $0x10] sm:$0xff] }
  0xf9   :  { %v179_v40 = vadd.f32 %v178_v39, %v907_v47  ;;  %v202_v47 = vld [vmem:[%s987_s3 + $0x8] sm:$0xff] }
  0xfa   :  { %v198_v41 = vmax.f32 %v184_v38, 0.0 }
  0xfb   :  { %v197_v42 = vmax.f32 %v179_v40, 0.0  ;;  %v654_v43 = vpop.f32.mrb[2].mxu1 }
  0xfc   :  { %v194_v44 = vadd.f32 %v654_v43, %v917_v51  ;;  %v188_v45 = vpop.f32.mrb[3].mxu1  ;;  %v773_v51 = vmov 0.0|0.0  }
  0xfd   :  { %v696_v46 = vpack.c.bf16 %v198_v41, %v197_v42  ;;  %v189_v55 = vadd.f32 %v188_v45, %v909_v48  ;;  %v204_v48 = vld [vmem:[%s987_s3 + $0x18] sm:$0xff]  ;;  %704 = vmatprep.subr.bf16.mxu0 %v773_v51 }
  0xfe   :  { %v200_v49 = vmax.f32 %v194_v44, 0.0 }
  0xff   :  { %v199_v52 = vmax.f32 %v189_v55, 0.0  ;;  %697 = vmatprep.subr.bf16.mxu1 %v696_v46 }
 0x100   :  { %699 = vmatpush3.bf16.msra.mxu1 %v696_v46 }
 0x101   :  { %v700_v53 = vpack.c.bf16 %v200_v49, %v199_v52 }
 0x103   :  { %701 = vmatprep.subr.bf16.mxu1 %v700_v53 }
 0x104   :  { %703 = vmatpush3.bf16.msra.mxu1 %v700_v53 }
 0x107   :  { %664 = vmatmul.mubr.msk.f32.vlgmr.msra.gmra.mrb[4].mxu1 %vm229_vm9, %v202_v47 }
 0x108   :  { %666 = vmatprep.mubr.msk.f32.mxu1 %vm229_vm9, %v203_v50 }
 0x10b   :  { %667 = vmatmul.mubr.msk.f32.gmra.mrb[6].mxu1 %vm229_vm9, %v204_v48 }
 0x1da   :  { %v665_v56 = vpop.f32.mrb[4].mxu1 }
 0x1db   :  { %v314_v57 = vadd.f32 %v665_v56, %v217_v14  ;;  %v308_v59 = vpop.f32.mrb[5].mxu1 }
 0x1dc   :  { %v309_v60 = vadd.f32 %v308_v59, %v936_v10  ;;  %v507_v10 = vadd.f32 %v494_v1, %v479_v4 }
 0x1dd   :  { %v328_v62 = vmax.f32 %v314_v57, 0.0 }
 0x1de   :  { %v327_v63 = vmax.f32 %v309_v60, 0.0  ;;  %v668_v0 = vpop.f32.mrb[6].mxu1  ;;  %v511_v16 = vmax.f32 %v507_v10, 0.0 }
 0x1df   :  { %v324_v2 = vadd.f32 %v668_v0, %v227_v20  ;;  %v318_v3 = vpop.f32.mrb[7].mxu1  ;;  %v504_v20 = vpop.permute.xlu1 %503 }
 0x1e0   :  { %v319_v6 = vadd.f32 %v318_v3, %v941_v17  ;;  %v705_v7 = vpack.c.bf16 %v328_v62, %v327_v63  ;;  %v714_v17 = vpack.c.bf16 %v512_v18, %v511_v16  ;;  %v509_v21 = vadd.f32 %v504_v20, %v481_v19 }
 0x1e1   :  { %v330_v8 = vmax.f32 %v324_v2, 0.0 }
 0x1e2   :  { %v329_v9 = vmax.f32 %v319_v6, 0.0  ;;  %706 = vmatpush3.bf16.msra.mxu0 %v705_v7  ;;  %v513_v22 = vmax.f32 %v509_v21, 0.0 }
 0x1e3   :  { %707 = vmatprep.subr.bf16.mxu0 %v773_v51 }
 0x1e4   :  { %v708_v14 = vpack.c.bf16 %v330_v8, %v329_v9 }
 0x1e6   :  { %709 = vmatpush3.bf16.msra.mxu0 %v708_v14 }
 0x1e7   :  { %710 = vmatprep.subr.bf16.mxu0 %v773_v51 }
 0x1ea   :  { %712 = vmatpush3.bf16.msra.mxu0 %v711_v35 }
 0x1eb   :  { %713 = vmatprep.subr.bf16.mxu0 %v773_v51 }
 0x1ee   :  { %715 = vmatpush3.bf16.msra.mxu0 %v714_v17 }
 0x1ef   :  { %685 = vmatprep.subr.mxu0 %v765_v36 }
 0x1f2   :  { %686 = vmatpush3.msra.mxu0 %v513_v22 }
 0x1f3   :  { %688 = vmatmul.mubr.msk.f32.vlgmr.msra.gmra.mrb[0].mxu0 %vm515_vm8, %v514_v23 }
 0x2c6   :  { %v585_v13 = vpop.f32.mrb[0].mxu0 }
 0x2c7   :  { %589 = vst [vmem:[#allocation2] sm:$0x1] %v585_v13  ;;  %v689_v24 = vpop.f32.mrb[1].mxu0 }
 0x2c8   :  { %751 = shalt.err (!%p748_p4)
}
 0x2c9   :  { %s752_s9 = scalar_lea.hbm %s994_s10, 16 }
 0x2ca   :  { %p753_p5 = scmp.ne.s32.totalorder %s994_s10, %s752_s9  ;;  %p756_p6 = scmp.lt.u32.totalorder %s752_s9, %s994_s10 }
 0x2cc   :  { %p758_p7 = pnand %p756_p6, %p753_p5 }
 0x2ce   :  { %761 = shalt.err (!%p758_p7)
}
 0x2cf   :  { %599 = dma.vmem_to_hbm [thread:$0]  %s597_s4, 16, %s994_s10, [#allocation3]  }
 0x2d0   :  { %762 = dma.done.wait [#allocation3], 16  }
 0x2d1   :  { %763 = vsyncadd [#allocation3], 4294967280 }
 0x2d2   :  { %603 = vsyncpa [#allocation3], 1 }

</bundles_post_ra>
